<compile_context>
chip_gen: v7x
topology: tpu7x:2x2x1
jax: 0.10.0
libtpu: 0.0.40
codegen_flags: <defaults>
</compile_context>

<pallas_src>
import math

import jax
import jax.numpy as jnp
from jax.experimental import pallas as pl
from jax.experimental.pallas import tpu as pltpu


def _round_up(x, m):
    return ((x + m - 1) // m) * m


def _mha_kernel(state_ref, ctx_ref, mask_ref,
                ww_ref, wkv_ref, wfc_ref,
                sel_hn_ref, sel_nh_ref, out_ref):
    TB, N, D = ctx_ref.shape
    hidden = wkv_ref.shape[1] // 2

    s = state_ref[...]                                   # (TB, dcat)      bf16
    c = ctx_ref[...].reshape(TB * N, D)                  # (TB*N, D)       bf16

    # Q projection (softmax scale `norm` already folded into ww in wrapper).
    q = jnp.dot(s, ww_ref[...], preferred_element_type=jnp.float32)       # (TB, H)

    # Fused K/V projection: single MXU pass, then static lane split.
    kv = jnp.dot(c, wkv_ref[...], preferred_element_type=jnp.float32)     # (TB*N, 2H)
    k = kv[:, :hidden]
    v = kv[:, hidden:]

    # Per-head logits: broadcast q over nodes, elementwise q*k, head-reduce
    # via the precomputed selector matrix (hidden, G_pad) on the MXU.
    qk = (q[:, None, :] * k.reshape(TB, N, hidden)).reshape(TB * N, hidden)
    logits = jnp.dot(qk, sel_hn_ref[...], preferred_element_type=jnp.float32)
    logits = logits.reshape(TB, N, -1)                   # (TB, N, G_pad)  f32

    # Lane-major softmax: heads -> sublanes, nodes -> lanes (small XLU
    # transpose), so all elementwise/EUP work runs on lane-dense vregs.
    logits_ln = jnp.swapaxes(logits, 1, 2)               # (TB, G_pad, N)
    bias = mask_ref[...] * jnp.float32(-1e30)            # additive mask, f32
    logits_ln = logits_ln + bias[:, None, :]
    lmax = jnp.max(logits_ln, axis=-1, keepdims=True)    # (TB, G_pad, 1)
    e = jnp.exp(logits_ln - lmax)
    denom = jnp.sum(e, axis=-1, keepdims=True)
    p_ln = e / denom                                     # exact: rows sum to 1
    p = jnp.swapaxes(p_ln, 1, 2).reshape(TB * N, -1)     # (TB*N, G_pad)

    # Expand per-head probabilities back to the hidden axis, weight V and
    # reduce over nodes.
    p_full = jnp.dot(p, sel_nh_ref[...], preferred_element_type=jnp.float32)
    attn = jnp.sum((p_full * v).reshape(TB, N, hidden), axis=1)            # (TB, H)

    # Final fc into the lane-dense (128-multiple) padded output block.
    out_ref[...] = jnp.dot(attn.astype(jnp.bfloat16), wfc_ref[...],
                           preferred_element_type=jnp.float32)


def mha_forward(state_t, context, mask, params, *, n_heads, s_mask=True):
    """Pallas implementation of MHAlayer.forward.  Returns (B, hidden)."""
    B, _, dcat = state_t.shape
    _, N, D = context.shape
    ww, wk, wv, wfc = params                      # torch nn.Linear layout (out, in)
    hidden = ww.shape[0]
    head_dim = hidden // n_heads
    norm = 1.0 / math.sqrt(hidden / n_heads)      # matches float head_dim in torch

    G_pad = _round_up(n_heads, 8)                 # padded head axis (zero selectors)
    N_pad = _round_up(N, 8)                       # node axis: sublane multiple
    H_out = _round_up(hidden, 128)                # lane-dense output width

    # ---- batch tile selection -------------------------------------------------
    # Rough live f32 bytes per batch row inside one step (kv/qk/p_full/logits...).
    per_row = 4 * N_pad * (6 * hidden + 2 * G_pad + D) \
        + 4 * (dcat + 2 * hidden + 2 * H_out)
    budget = 20 * 2 ** 20                         # keeps tiles safe on v7x (64 MiB VMEM)
    tb_cap = max(8, min(256, (budget // max(per_row, 1)) // 8 * 8))
    B8 = _round_up(B, 8)
    # >= 2 grid steps when B > 8 so ("parallel",) can shard across v7x's 2 TCs;
    # TB is the multiple of 8 that minimizes batch padding under tb_cap.
    steps = 1 if B8 <= 8 else max(2, -(-B8 // tb_cap))
    TB = _round_up(-(-B8 // steps), 8)
    B_pad = TB * steps

    # ---- operands: bf16 matmul inputs, f32 mask, padded node/batch axes --------
    state2 = state_t.reshape(B, dcat).astype(jnp.bfloat16)
    ctx = context.astype(jnp.bfloat16)
    if s_mask:
        mask_f = (mask != 0).astype(jnp.float32)  # nonzero => masked (torch .bool())
    else:
        mask_f = jnp.zeros((B, N), jnp.float32)
    state2 = jnp.pad(state2, ((0, B_pad - B), (0, 0)))
    ctx = jnp.pad(ctx, ((0, B_pad - B), (0, N_pad - N), (0, 0)))
    # padded nodes / padded batch rows are always masked out
    mask_f = jnp.pad(mask_f, ((0, B_pad - B), (0, N_pad - N)), constant_values=1.0)

    # ---- weights: norm folded into Wq, fused K/V, fc padded to 128k columns ----
    ww_t = (ww.T * jnp.float32(norm)).astype(jnp.bfloat16)                 # (dcat, H)
    wkv_t = jnp.concatenate([wk.T, wv.T], axis=1).astype(jnp.bfloat16)     # (D, 2H)
    wfc_t = jnp.pad(wfc.T, ((0, 0), (0, H_out - hidden))).astype(jnp.bfloat16)

    # Head-selector matrices (tiny f32 constants, resident in VMEM).
    h_of_feat = jnp.arange(hidden, dtype=jnp.int32) // head_dim
    sel_hn = (h_of_feat[:, None] ==
              jnp.arange(G_pad, dtype=jnp.int32)[None, :]).astype(jnp.float32)  # (H, G_pad)
    sel_nh = sel_hn.T                                                            # (G_pad, H)

    # ---- explicit scoped-VMEM limit (default is only 16/32 MiB) ---------------
    resident = 2 * (dcat * hidden + 2 * D * hidden + hidden * H_out) \
        + 4 * 2 * G_pad * hidden
    blocks = 2 * TB * (2 * dcat + 2 * N_pad * D + 4 * N_pad + 4 * H_out)
    need = TB * per_row + blocks + resident
    vmem_limit = int(min(max(2 * need, 16 * 2 ** 20), 48 * 2 ** 20))

    out = pl.pallas_call(
        _mha_kernel,
        out_shape=jax.ShapeDtypeStruct((B_pad, H_out), jnp.float32),
        grid_spec=pltpu.PrefetchScalarGridSpec(
            num_scalar_prefetch=0,
            grid=(B_pad // TB,),
            in_specs=[
                pl.BlockSpec((TB, dcat), lambda i: (i, 0)),            # state
                pl.BlockSpec((TB, N_pad, D), lambda i: (i, 0, 0)),     # context
                pl.BlockSpec((TB, N_pad), lambda i: (i, 0)),           # mask
                pl.BlockSpec((dcat, hidden), lambda i: (0, 0)),        # Wq (scaled)
                pl.BlockSpec((D, 2 * hidden), lambda i: (0, 0)),       # Wk|Wv fused
                pl.BlockSpec((hidden, H_out), lambda i: (0, 0)),       # Wfc (padded)
                pl.BlockSpec((hidden, G_pad), lambda i: (0, 0)),       # sel_hn
                pl.BlockSpec((G_pad, hidden), lambda i: (0, 0)),       # sel_nh
            ],
            out_specs=pl.BlockSpec((TB, H_out), lambda i: (i, 0)),
        ),
        compiler_params=pltpu.CompilerParams(
            dimension_semantics=("parallel",),
            vmem_limit_bytes=vmem_limit),
    )(state2, ctx, mask_f, ww_t, wkv_t, wfc_t, sel_hn, sel_nh)

    return out[:B, :hidden]


def mha_reference(state_t, context, mask, params, *, n_heads, s_mask=True):
    """Pure-JAX f32 reference mirroring the PyTorch forward exactly."""
    ww, wk, wv, wfc = params
    B, N, D = context.shape
    hidden = ww.shape[0]
    hd = hidden // n_heads
    norm = 1.0 / math.sqrt(hidden / n_heads)
    Q = (state_t @ ww.T).reshape(B, 1, n_heads, hd).transpose(0, 2, 1, 3)
    K = (context @ wk.T).reshape(B, N, n_heads, hd).transpose(0, 2, 1, 3)
    V = (context @ wv.T).reshape(B, N, n_heads, hd).transpose(0, 2, 1, 3)
    compat = norm * jnp.einsum('bhqd,bhkd->bhqk', Q, K)
    u = compat[:, :, 0, :]                                   # (B, n_heads, N)
    if s_mask:
        u = jnp.where(mask[:, None, :] > 0, -jnp.inf, u)
    scores = jax.nn.softmax(u, axis=-1)
    out = jnp.einsum('bhn,bhnd->bhd', scores, V).reshape(B, hidden)
    return out @ wfc.T


if __name__ == "__main__":
    # Small, module-consistent shapes.
    B, n_heads, cat, input_dim, hidden_dim, n_nodes = 2, 4, 3, 8, 32, 8
    dcat = input_dim * cat

    key = jax.random.PRNGKey(0)
    k1, k2, k3, k4, k5, k6, k7 = jax.random.split(key, 7)

    def linear_init(k, out_f, in_f):
        bound = 1.0 / math.sqrt(in_f)
        return jax.random.uniform(k, (out_f, in_f), jnp.float32, -bound, bound)

    # Deterministic synthetic parameters (torch nn.Linear layout: (out, in)).
    ww = linear_init(k1, hidden_dim, dcat)         # self.w
    wk = linear_init(k2, hidden_dim, input_dim)    # self.k
    wv = linear_init(k3, hidden_dim, input_dim)    # self.v
    wfc = linear_init(k4, hidden_dim, hidden_dim)  # self.fc
    params = (ww, wk, wv, wfc)

    state_t = jax.random.normal(k5, (B, 1, dcat), jnp.float32)
    context = jax.random.normal(k6, (B, n_nodes, input_dim), jnp.float32)
    mask = (jax.random.uniform(k7, (B, n_nodes)) < 0.3).astype(jnp.float32)
    mask = mask.at[:, 0].set(0.0)  # keep at least one unmasked node per row

    out = mha_forward(state_t, context, mask, params, n_heads=n_heads, s_mask=True)
    out = jax.block_until_ready(out)

    ref = mha_reference(state_t, context, mask, params, n_heads=n_heads, s_mask=True)
    assert out.shape == (B, hidden_dim)
    # Tolerance covers the bf16 cast of the matmul operands (softmax itself is
    # exact f32 with an exact divide).
    assert jnp.allclose(out, ref, atol=4e-2, rtol=4e-2), "mismatch vs reference"

    print("KERNEL_OK")
</pallas_src>

<mosaic_0001>
module attributes {stable_mosaic.version = 11 : i64} {
  func.func @_mha_kernel(%arg0: i32, %arg1: memref<8x24xbf16, #tpu.memory_space<vmem>>, %arg2: memref<8x8x8xbf16, #tpu.memory_space<vmem>>, %arg3: memref<8x8xf32, #tpu.memory_space<vmem>>, %arg4: memref<24x32xbf16, #tpu.memory_space<vmem>>, %arg5: memref<8x64xbf16, #tpu.memory_space<vmem>>, %arg6: memref<32x128xbf16, #tpu.memory_space<vmem>>, %arg7: memref<32x8xf32, #tpu.memory_space<vmem>>, %arg8: memref<8x32xf32, #tpu.memory_space<vmem>>, %arg9: memref<8x128xf32, #tpu.memory_space<vmem>>) attributes {dimension_semantics = [#tpu.dimension_semantics<parallel>], iteration_bounds = array<i64: 1>, scalar_prefetch = 0 : i64, scratch_operands = 0 : i64, tpu.core_type = #tpu.core_type<tc>, window_params = [{transform_indices = @transform_0, window_bounds = array<i64: 8, 24>}, {transform_indices = @transform_1, window_bounds = array<i64: 8, 8, 8>}, {transform_indices = @transform_2, window_bounds = array<i64: 8, 8>}, {pipeline_mode = #tpu.pipeline_mode<synchronous>, transform_indices = @transform_3, window_bounds = array<i64: 24, 32>}, {pipeline_mode = #tpu.pipeline_mode<synchronous>, transform_indices = @transform_4, window_bounds = array<i64: 8, 64>}, {pipeline_mode = #tpu.pipeline_mode<synchronous>, transform_indices = @transform_5, window_bounds = array<i64: 32, 128>}, {pipeline_mode = #tpu.pipeline_mode<synchronous>, transform_indices = @transform_6, window_bounds = array<i64: 32, 8>}, {pipeline_mode = #tpu.pipeline_mode<synchronous>, transform_indices = @transform_7, window_bounds = array<i64: 8, 32>}, {transform_indices = @transform_8, window_bounds = array<i64: 8, 128>}]} {
    %c0 = arith.constant 0 : index
    %c0_0 = arith.constant 0 : index
    %0 = vector.load %arg1[%c0, %c0_0] : memref<8x24xbf16, #tpu.memory_space<vmem>>, vector<8x24xbf16>
    %c0_1 = arith.constant 0 : index
    %c0_2 = arith.constant 0 : index
    %c0_3 = arith.constant 0 : index
    %1 = vector.load %arg2[%c0_1, %c0_2, %c0_3] : memref<8x8x8xbf16, #tpu.memory_space<vmem>>, vector<8x8x8xbf16>
    %2 = vector.shape_cast %1 : vector<8x8x8xbf16> to vector<64x8xbf16>
    %c0_4 = arith.constant 0 : index
    %c0_5 = arith.constant 0 : index
    %3 = vector.load %arg4[%c0_4, %c0_5] : memref<24x32xbf16, #tpu.memory_space<vmem>>, vector<24x32xbf16>
    %cst = arith.constant dense<0.000000e+00> : vector<8x32xf32>
    %4 = tpu.matmul %0, %3, %cst {dimension_numbers = #tpu.dot_dimension_numbers<[1], [0], [0], [1], [0, 0, 1, 1], [], []>} : vector<8x24xbf16>, vector<24x32xbf16>, vector<8x32xf32> -> vector<8x32xf32>
    %c0_6 = arith.constant 0 : index
    %c0_7 = arith.constant 0 : index
    %5 = vector.load %arg5[%c0_6, %c0_7] : memref<8x64xbf16, #tpu.memory_space<vmem>>, vector<8x64xbf16>
    %cst_8 = arith.constant dense<0.000000e+00> : vector<64x64xf32>
    %6 = tpu.matmul %2, %5, %cst_8 {dimension_numbers = #tpu.dot_dimension_numbers<[1], [0], [0], [1], [0, 0, 1, 1], [], []>} : vector<64x8xbf16>, vector<8x64xbf16>, vector<64x64xf32> -> vector<64x64xf32>
    %7 = vector.extract_strided_slice %6 {offsets = [0, 0], sizes = [64, 32], strides = [1, 1]} : vector<64x64xf32> to vector<64x32xf32>
    %8 = vector.extract_strided_slice %6 {offsets = [0, 32], sizes = [64, 32], strides = [1, 1]} : vector<64x64xf32> to vector<64x32xf32>
    %9 = vector.shape_cast %4 : vector<8x32xf32> to vector<8x1x32xf32>
    %10 = vector.shape_cast %7 : vector<64x32xf32> to vector<8x8x32xf32>
    %11 = vector.broadcast %9 : vector<8x1x32xf32> to vector<8x8x32xf32>
    %12 = arith.mulf %11, %10 : vector<8x8x32xf32>
    %13 = vector.shape_cast %12 : vector<8x8x32xf32> to vector<64x32xf32>
    %c0_9 = arith.constant 0 : index
    %c0_10 = arith.constant 0 : index
    %14 = vector.load %arg7[%c0_9, %c0_10] : memref<32x8xf32, #tpu.memory_space<vmem>>, vector<32x8xf32>
    %cst_11 = arith.constant dense<0.000000e+00> : vector<64x8xf32>
    %15 = tpu.matmul %13, %14, %cst_11 {dimension_numbers = #tpu.dot_dimension_numbers<[1], [0], [0], [1], [0, 0, 1, 1], [], []>} : vector<64x32xf32>, vector<32x8xf32>, vector<64x8xf32> -> vector<64x8xf32>
    %16 = vector.shape_cast %15 : vector<64x8xf32> to vector<8x8x8xf32>
    %17 = tpu.transpose %16, [0, 2, 1] : vector<8x8x8xf32> -> vector<8x8x8xf32>
    %c0_12 = arith.constant 0 : index
    %c0_13 = arith.constant 0 : index
    %18 = vector.load %arg3[%c0_12, %c0_13] : memref<8x8xf32, #tpu.memory_space<vmem>>, vector<8x8xf32>
    %cst_14 = arith.constant -1.000000e+30 : f32
    %19 = vector.broadcast %cst_14 : f32 to vector<8x8xf32>
    %20 = arith.mulf %18, %19 : vector<8x8xf32>
    %21 = vector.shape_cast %20 : vector<8x8xf32> to vector<8x1x8xf32>
    %22 = vector.broadcast %21 : vector<8x1x8xf32> to vector<8x8x8xf32>
    %23 = arith.addf %17, %22 : vector<8x8x8xf32>
    %cst_15 = arith.constant dense<0xFF800000> : vector<8x8xf32>
    %24 = vector.multi_reduction <maximumf>, %23, %cst_15 [2] : vector<8x8x8xf32> to vector<8x8xf32>
    %25 = vector.shape_cast %24 : vector<8x8xf32> to vector<8x8x1xf32>
    %26 = vector.broadcast %25 : vector<8x8x1xf32> to vector<8x8x8xf32>
    %27 = arith.subf %23, %26 : vector<8x8x8xf32>
    %28 = math.exp %27 : vector<8x8x8xf32>
    %cst_16 = arith.constant dense<0.000000e+00> : vector<8x8xf32>
    %29 = vector.multi_reduction <add>, %28, %cst_16 [2] : vector<8x8x8xf32> to vector<8x8xf32>
    %30 = vector.shape_cast %29 : vector<8x8xf32> to vector<8x8x1xf32>
    %31 = vector.broadcast %30 : vector<8x8x1xf32> to vector<8x8x8xf32>
    %32 = arith.divf %28, %31 : vector<8x8x8xf32>
    %33 = tpu.transpose %32, [0, 2, 1] : vector<8x8x8xf32> -> vector<8x8x8xf32>
    %34 = vector.shape_cast %33 : vector<8x8x8xf32> to vector<64x8xf32>
    %c0_17 = arith.constant 0 : index
    %c0_18 = arith.constant 0 : index
    %35 = vector.load %arg8[%c0_17, %c0_18] : memref<8x32xf32, #tpu.memory_space<vmem>>, vector<8x32xf32>
    %cst_19 = arith.constant dense<0.000000e+00> : vector<64x32xf32>
    %36 = tpu.matmul %34, %35, %cst_19 {dimension_numbers = #tpu.dot_dimension_numbers<[1], [0], [0], [1], [0, 0, 1, 1], [], []>} : vector<64x8xf32>, vector<8x32xf32>, vector<64x32xf32> -> vector<64x32xf32>
    %37 = arith.mulf %36, %8 : vector<64x32xf32>
    %38 = vector.shape_cast %37 : vector<64x32xf32> to vector<8x8x32xf32>
    %cst_20 = arith.constant dense<0.000000e+00> : vector<8x32xf32>
    %39 = vector.multi_reduction <add>, %38, %cst_20 [1] : vector<8x8x32xf32> to vector<8x32xf32>
    %40 = arith.truncf %39 : vector<8x32xf32> to vector<8x32xbf16>
    %c0_21 = arith.constant 0 : index
    %c0_22 = arith.constant 0 : index
    %41 = vector.load %arg6[%c0_21, %c0_22] : memref<32x128xbf16, #tpu.memory_space<vmem>>, vector<32x128xbf16>
    %cst_23 = arith.constant dense<0.000000e+00> : vector<8x128xf32>
    %42 = tpu.matmul %40, %41, %cst_23 {dimension_numbers = #tpu.dot_dimension_numbers<[1], [0], [0], [1], [0, 0, 1, 1], [], []>} : vector<8x32xbf16>, vector<32x128xbf16>, vector<8x128xf32> -> vector<8x128xf32>
    %c0_24 = arith.constant 0 : index
    %c0_25 = arith.constant 0 : index
    %43 = vector.load %arg9[%c0_24, %c0_25] : memref<8x128xf32, #tpu.memory_space<vmem>>, vector<8x128xf32>
    tpu.vector_store %arg9[%c0_24, %c0_25], %42 {strides = array<i32>} : memref<8x128xf32, #tpu.memory_space<vmem>>, vector<8x128xf32>,
    return
  }
  func.func @transform_0(%arg0: i32) -> (i32, i32) {
    %c0_i32 = arith.constant 0 : i32
    %c0_i32_0 = arith.constant 0 : i32
    return %arg0, %c0_i32 : i32, i32
  }
  func.func @transform_1(%arg0: i32) -> (i32, i32, i32) {
    %c0_i32 = arith.constant 0 : i32
    %c0_i32_0 = arith.constant 0 : i32
    %c0_i32_1 = arith.constant 0 : i32
    return %arg0, %c0_i32, %c0_i32_0 : i32, i32, i32
  }
  func.func @transform_2(%arg0: i32) -> (i32, i32) {
    %c0_i32 = arith.constant 0 : i32
    %c0_i32_0 = arith.constant 0 : i32
    return %arg0, %c0_i32 : i32, i32
  }
  func.func @transform_3(%arg0: i32) -> (i32, i32) {
    %c0_i32 = arith.constant 0 : i32
    %c0_i32_0 = arith.constant 0 : i32
    %c0_i32_1 = arith.constant 0 : i32
    return %c0_i32, %c0_i32_0 : i32, i32
  }
  func.func @transform_4(%arg0: i32) -> (i32, i32) {
    %c0_i32 = arith.constant 0 : i32
    %c0_i32_0 = arith.constant 0 : i32
    %c0_i32_1 = arith.constant 0 : i32
    return %c0_i32, %c0_i32_0 : i32, i32
  }
  func.func @transform_5(%arg0: i32) -> (i32, i32) {
    %c0_i32 = arith.constant 0 : i32
    %c0_i32_0 = arith.constant 0 : i32
    %c0_i32_1 = arith.constant 0 : i32
    return %c0_i32, %c0_i32_0 : i32, i32
  }
  func.func @transform_6(%arg0: i32) -> (i32, i32) {
    %c0_i32 = arith.constant 0 : i32
    %c0_i32_0 = arith.constant 0 : i32
    %c0_i32_1 = arith.constant 0 : i32
    return %c0_i32, %c0_i32_0 : i32, i32
  }
  func.func @transform_7(%arg0: i32) -> (i32, i32) {
    %c0_i32 = arith.constant 0 : i32
    %c0_i32_0 = arith.constant 0 : i32
    %c0_i32_1 = arith.constant 0 : i32
    return %c0_i32, %c0_i32_0 : i32, i32
  }
  func.func @transform_8(%arg0: i32) -> (i32, i32) {
    %c0_i32 = arith.constant 0 : i32
    %c0_i32_0 = arith.constant 0 : i32
    return %arg0, %c0_i32 : i32, i32
  }
}

</mosaic_0001>

<bundles_post_ra>
// kernel: tpu_custom_call.1
= control target key start
LH: loop header
LB: loop body
LE: loop exit
PB: predicated region body
PF: predicated region fallthrough
CT: control target
= control target key end

     0   :  { %13 = vsyncpa [#allocation3], 0  ;;  %s2091_s0 = inlined_call_operand.hbm [shape: bf16[8,24], index: 0, kind: input, shape index: {}]   ;;  %s2092_s1 = inlined_call_operand.vmem [shape: bf16[8,8,8], index: 1, kind: input, shape index: {}]   ;;  %s2093_s2 = inlined_call_operand.hbm [shape: f32[8,8], index: 2, kind: input, shape index: {}]   ;;  %s2094_s3 = inlined_call_operand.hbm [shape: bf16[24,32], index: 3, kind: input, shape index: {}]   ;;  %s2095_s4 = inlined_call_operand.hbm [shape: bf16[8,64], index: 4, kind: input, shape index: {}]   ;;  %s2096_s5 = inlined_call_operand.vmem [shape: bf16[32,128], index: 5, kind: input, shape index: {}]   ;;  %s2097_s6 = inlined_call_operand.vmem [shape: f32[32,8], index: 6, kind: input, shape index: {}]   ;;  %s2098_s7 = inlined_call_operand.vmem [shape: f32[8,32], index: 7, kind: input, shape index: {}]   ;;  %s2099_s8 = inlined_call_operand.hbm [shape: f32[8,128], index: 8, kind: output, shape index: {}]  }
   0x1   :  { %14 = vsyncpa [#allocation6], 0 }
   0x2   :  { %15 = vsyncpa [#allocation9], 0 }
   0x3   :  { %16 = vsyncpa [#allocation4], 0  ;;  %s1825_s27 = smov [#allocation5]   ;;  %s1826_s29 = smov [#allocation2]  }
   0x4   :  { %s35_s28 = sshll.u32 %s1825_s27, 4  ;;  %s23_s30 = sshll.u32 %s1826_s29, 4  ;;  %s36_s28 = int_to_ptr.vmem [resolvable:$true] %s35_s28  ;;  %s24_s30 = int_to_ptr.vmem [resolvable:$true] %s23_s30 }
   0x5   :  { %s1707_s11 = scalar_lea.hbm %s2093_s2, 128 }
   0x6   :  { %p1708_p0 = scmp.ne.s32.totalorder %s2093_s2, %s1707_s11  ;;  %p1711_p1 = scmp.lt.u32.totalorder %s1707_s11, %s2093_s2 }
   0x8   :  { %p1713_p2 = pnand %p1711_p1, %p1708_p0 }
   0xa   :  { %1716 = shalt.err (!%p1713_p2)
}
   0xb   :  { %s1717_s16 = scalar_lea.vmem %s36_s28, 128  ;;  %p1722_p4 = scmp.lt.s32.totalorder %s36_s28, %s36_s28 }
   0xc   :  { %p1718_p3 = scmp.ne.s32.totalorder %s36_s28, %s1717_s16  ;;  %p1723_p5 = scmp.lt.s32.totalorder %s1717_s16, %s1717_s16 }
   0xe   :  { %p1724_p6 = por %p1723_p5, %p1722_p4 }
  0x10   :  { %p1725_p7 = pnand %p1724_p6, %p1718_p3 }
  0x12   :  { %1728 = shalt.err (!%p1725_p7)
}
  0x13   :  { %38 = dma.hbm_to_vmem [thread:$0]  %s2093_s2, 128, %s36_s28, [#allocation6]  }
  0x14   :  { %s1729_s21 = scalar_lea.hbm %s2091_s0, 64 }
  0x15   :  { %p1730_p8 = scmp.ne.s32.totalorder %s2091_s0, %s1729_s21  ;;  %p1733_p9 = scmp.lt.u32.totalorder %s1729_s21, %s2091_s0 }
  0x17   :  { %p1735_p10 = pnand %p1733_p9, %p1730_p8 }
  0x19   :  { %1738 = shalt.err (!%p1735_p10)
}
  0x1a   :  { %s1739_s26 = scalar_lea.vmem %s24_s30, 64  ;;  %p1744_p12 = scmp.lt.s32.totalorder %s24_s30, %s24_s30 }
  0x1b   :  { %p1740_p11 = scmp.ne.s32.totalorder %s24_s30, %s1739_s26  ;;  %p1745_p13 = scmp.lt.s32.totalorder %s1739_s26, %s1739_s26 }
  0x1d   :  { %p1746_p0 = por %p1745_p13, %p1744_p12 }
  0x1f   :  { %p1747_p1 = pnand %p1746_p0, %p1740_p11 }
  0x21   :  { %1750 = shalt.err (!%p1747_p1)
}
  0x22   :  { %26 = dma.hbm_to_vmem [thread:$0]  %s2091_s0, 64, %s24_s30, [#allocation3]  }
  0x23   :  { %s1827_s28 = smov [#allocation7]   ;;  %s1751_s11 = scalar_lea.hbm %s2094_s3, 192 }
  0x24   :  { %s44_s29 = sshll.u32 %s1827_s28, 4  ;;  %p1752_p2 = scmp.ne.s32.totalorder %s2094_s3, %s1751_s11  ;;  %s45_s29 = int_to_ptr.vmem [resolvable:$true] %s44_s29 }
  0x25   :  { %p1755_p3 = scmp.lt.u32.totalorder %s1751_s11, %s2094_s3 }
  0x27   :  { %p1757_p4 = pnand %p1755_p3, %p1752_p2 }
  0x29   :  { %1760 = shalt.err (!%p1757_p4)
}
  0x2a   :  { %s1761_s16 = scalar_lea.vmem %s45_s29, 192  ;;  %p1766_p6 = scmp.lt.s32.totalorder %s45_s29, %s45_s29 }
  0x2b   :  { %p1762_p5 = scmp.ne.s32.totalorder %s45_s29, %s1761_s16  ;;  %p1767_p7 = scmp.lt.s32.totalorder %s1761_s16, %s1761_s16 }
  0x2d   :  { %p1768_p8 = por %p1767_p7, %p1766_p6 }
  0x2f   :  { %p1769_p9 = pnand %p1768_p8, %p1762_p5 }
  0x31   :  { %1772 = shalt.err (!%p1769_p9)
}
  0x32   :  { %s1828_s0 = smov 64   ;;  %s1829_s30 = smov 4  }
  0x33   :  { %50 = dma.hbm_to_vmem [thread:$0]  %s2094_s3, 192, %s45_s29, [#allocation6], %s1828_s0, %s1828_s0, %s1829_s30  }
  0x34   :  { %s1830_s19 = smov [#allocation8]   ;;  %s1773_s23 = scalar_lea.hbm %s2095_s4, 64 }
  0x35   :  { %s57_s20 = sshll.u32 %s1830_s19, 4  ;;  %p1774_p10 = scmp.ne.s32.totalorder %s2095_s4, %s1773_s23  ;;  %s58_s20 = int_to_ptr.vmem [resolvable:$true] %s57_s20 }
  0x36   :  { %p1777_p11 = scmp.lt.u32.totalorder %s1773_s23, %s2095_s4 }
  0x38   :  { %p1779_p12 = pnand %p1777_p11, %p1774_p10 }
  0x3a   :  { %1782 = shalt.err (!%p1779_p12)
}
  0x3b   :  { %s1783_s27 = scalar_lea.vmem %s58_s20, 64  ;;  %p1788_p0 = scmp.lt.s32.totalorder %s58_s20, %s58_s20 }
  0x3c   :  { %p1784_p13 = scmp.ne.s32.totalorder %s58_s20, %s1783_s27  ;;  %p1789_p1 = scmp.lt.s32.totalorder %s1783_s27, %s1783_s27 }
  0x3e   :  { %p1790_p2 = por %p1789_p1, %p1788_p0 }
  0x40   :  { %p1791_p3 = pnand %p1790_p2, %p1784_p13 }
  0x42   :  { %1794 = shalt.err (!%p1791_p3)
}
  0x43   :  { %60 = dma.hbm_to_vmem [thread:$0]  %s2095_s4, 64, %s58_s20, [#allocation9]  }
  0x44   :  { %1817 = dma.done.wait [#allocation3], 64  }
  0x45   :  { %1818 = vsyncadd [#allocation3], 4294967232 }
  0x46   :  { %1819 = dma.done.wait [#allocation6], 320  }
  0x47   :  { %1820 = vsyncadd [#allocation6], 4294966976 }
  0x48   :  { %1821 = dma.done.wait [#allocation9], 64  }
  0x49   :  { %1822 = vsyncadd [#allocation9], 4294967232  ;;  %v1831_v0 = vmov 0.0   ;;  %vm1832_vm0 = vmmov 0   ;;  %vm105_vm1 = vcmask 1043456   ;;  %v1667_v1 = vld [vmem:[#allocation7] sm:$0xff]   ;;  %v256_v19 = vlaneseq }
  0x4a   :  { %1587 = vmatprep.subr.bf16.mxu0 %v1831_v0  ;;  %1591 = vmatprep.mubr.msk.bf16.mxu0 %vm1832_vm0, %v1831_v0  ;;  %vm170_vm2 = vcmask 64512   ;;  %v149_v2 = vld [vmem:[#allocation8] sm:$0xf]  ;;  %v1668_v3 = vld [vmem:[#allocation7 + $0x8] ss:$0 sps:$4 sm:$0xff]   ;;  %v1669_v5 = vld [vmem:[%s2092_s1] sm:$0xff]  }
  0x4b   :  { %1588 = vmatpush3.bf16.msra.mxu0 %v1667_v1  ;;  %1655 = vmatprep.subr.msk.bf16.mxu1 %vm105_vm1, %v149_v2  ;;  %v184_v4 = vsel %vm105_vm1, %v149_v2, 0  ;;  %v107_v6 = vsel %vm105_vm1, %v1668_v3, 0  ;;  %v1670_v7 = vld [vmem:[%s2092_s1 + $0x8] sm:$0xff]   ;;  %vm101_vm3 = vcmask 195584   ;;  %v1671_v8 = vld [vmem:[%s2092_s1 + $0x10] sm:$0xff]   ;;  %v1672_v10 = vld [vmem:[%s2092_s1 + $0x18] sm:$0xff]  }
  0x4c   :  { %1589 = vmatprep.subr.bf16.mxu0 %v1831_v0  ;;  %1596 = vmatpush3.bf16.msra.mxu1 %v184_v4  ;;  %v80_v9 = vld [vmem:[#allocation2] sm:$0xf]  ;;  %v350_v12 = vld [vmem:[%s2097_s6 + $0x8] sm:$0xff]  ;;  %v351_v14 = vld [vmem:[%s2097_s6 + $0x10] sm:$0xff]  ;;  %v1833_v17 = vmov 1966171168  }
  0x4d   :  { %1597 = vmatprep.mubr.msk.bf16.mxu1 %vm170_vm2, %v1669_v5  ;;  %v349_v11 = vld [vmem:[%s2097_s6] sm:$0xff]  ;;  %v352_v15 = vld [vmem:[%s2097_s6 + $0x18] sm:$0xff]  ;;  %v254_v18 = vunpack.c.l.s4 %v1833_v17  ;;  %v257_v21 = vshrl.u32 %v256_v19, 7  ;;  %vm353_vm4 = vcmask 261120   ;;  %vm1437_vm5 = vcmask 1041409  }
  0x4e   :  { %v1647_v13 = vpack.c.bf16 %v350_v12, %v349_v11  ;;  %v1651_v16 = vpack.c.bf16 %v352_v15, %v351_v14  ;;  %vm1439_vm6 = vcmask 1042434   ;;  %vm1441_vm7 = vcmask 1043459  }
  0x4f   :  { %1590 = vmatpush3.bf16.msra.mxu0 %v107_v6  ;;  %1598 = vmatmul.mubr.msk.bf16.vlgmr.msra.gmra.mrb[0].mxu1 %vm170_vm2, %v1670_v7  ;;  %v255_v20 = vunpack.c.0.s8 %v254_v18  ;;  %v1973_v31 = vsub.s32 0, %v257_v21  ;;  %vm1443_vm8 = vcmask 1044484   ;;  %vm1445_vm9 = vcmask 1045509  }
  0x50   :  { %1601 = vmatprep.mubr.msk.bf16.mxu1 %vm170_vm2, %v1671_v8  ;;  %1648 = vmatprep.subr.bf16.mxu0 %v1647_v13  ;;  %vm1447_vm10 = vcmask 1046534   ;;  %vm1449_vm11 = vcmask 1047559  }
  0x51   :  { %v1962_v22 = vsub.s32 %v255_v20, %v257_v21 }
  0x52   :  { %1592 = vmatmul.mubr.msk.bf16.vlgmr.msra.gmra.mrb[0].mxu0 %vm101_vm3, %v80_v9 }
  0x53   :  { %1650 = vmatpush3.bf16.msra.mxu0 %v1647_v13 }
  0x54   :  { %1652 = vmatprep.subr.bf16.mxu0 %v1651_v16 }
  0x57   :  { %1602 = vmatmul.mubr.msk.bf16.gmra.mrb[4].mxu1 %vm170_vm2, %v1672_v10  ;;  %1654 = vmatpush3.bf16.msra.mxu0 %v1651_v16  ;;  %v739_v10 = vld [vmem:[#allocation5] sm:$0xff] }
  0x58   :  { %1639 = vmatprep.subr.bf16.mxu0 %v1831_v0  ;;  %v740_v11 = vmul.f32 -1e+30, %v739_v10 }
  0x5a   :  { %v749_v12 = vrot.slane %v740_v11, %v1962_v22  ;;  %v742_v15 = vcombine.high %v740_v11, %v740_v11 }
  0x5c   :  { %v757_v13 = vcombine.high %v749_v12, %v749_v12  ;;  %v765_v17 = vrot.slane %v749_v12, %v1962_v22  ;;  %v756_v18 = vrot.slane %v742_v15, %v1962_v22 }
  0x5e   :  { %v779_v14 = vrot.slane %v757_v13, %v1962_v22  ;;  %v794_v21 = vrot.slane %v765_v17, %v1973_v31 }
  0x60   :  { %v798_v16 = vrot.slane %v779_v14, %v1973_v31 }
 0x122   :  { %v1964_v23 = vpop.f32.mrb[0].mxu1 }
 0x123   :  { %v1966_v24 = vpop.f32.mrb[1].mxu1 }
 0x124   :  { %v1968_v25 = vpop.f32.mrb[2].mxu1 }
 0x125   :  { %v143_v26 = vpop.f32.mrb[0].mxu0  ;;  %v1970_v27 = vpop.f32.mrb[3].mxu1 }
 0x126   :  { %v252_v28 = vcombine.high %v143_v26, %v143_v26  ;;  %v259_v29 = vrot.slane %v143_v26, %v1962_v22  ;;  %v1593_v30 = vpop.f32.mrb[1].mxu0  ;;  %v787_v26 = vcombine.high %v765_v17, %v765_v17 }
 0x127   :  { %v146_v32 = vpop.f32.mrb[2].mxu0  ;;  %v789_v30 = vcombine.high %v779_v14, %v779_v14 }
 0x128   :  { %v266_v33 = vrot.slane %v252_v28, %v1962_v22  ;;  %v267_v34 = vcombine.high %v259_v29, %v259_v29  ;;  %v275_v35 = vrot.slane %v259_v29, %v1962_v22  ;;  %v1594_v36 = vpop.f32.mrb[3].mxu0  ;;  %v758_v28 = vcombine.high %v756_v18, %v756_v18 }
 0x129   :  { %v772_v29 = vrot.slane %v756_v18, %v1962_v22  ;;  %v802_v36 = vrot.slane %v787_v26, %v1973_v31 }
 0x12a   :  { %v268_v37 = vcombine.high %v266_v33, %v266_v33  ;;  %v282_v38 = vrot.slane %v266_v33, %v1962_v22  ;;  %v289_v39 = vrot.slane %v267_v34, %v1962_v22  ;;  %v297_v40 = vcombine.high %v275_v35, %v275_v35  ;;  %v1979_v41 = vpop.f32.mrb[4].mxu1 }
 0x12b   :  { %v304_v42 = vrot.slane %v275_v35, %v1973_v31  ;;  %v1982_v43 = vpop.f32.mrb[5].mxu1 }
 0x12c   :  { %v312_v44 = vrot.slane %v297_v40, %v1973_v31  ;;  %v299_v45 = vcombine.high %v289_v39, %v289_v39  ;;  %v308_v46 = vrot.slane %v289_v39, %v1973_v31  ;;  %v298_v47 = vcombine.high %v282_v38, %v282_v38  ;;  %v1986_v48 = vpop.f32.mrb[6].mxu1 }
 0x12d   :  { %v341_v49 = vmul.f32 %v304_v42, %v1966_v24  ;;  %v320_v50 = vrot.slane %v282_v38, %v1973_v31  ;;  %v296_v51 = vrot.slane %v268_v37, %v1962_v22  ;;  %v1991_v52 = vpop.f32.mrb[7].mxu1  ;;  %v786_v37 = vrot.slane %v758_v28, %v1962_v22 }
 0x12e   :  { %v343_v53 = vmul.f32 %v1964_v23, %v312_v44  ;;  %v316_v54 = vrot.slane %v299_v45, %v1973_v31  ;;  %v342_v55 = vmul.f32 %v308_v46, %v1970_v27  ;;  %v328_v56 = vrot.slane %v298_v47, %v1973_v31 }
 0x12f   :  { %v345_v57 = vmul.f32 %v320_v50, %v1982_v43  ;;  %v300_v58 = vcombine.high %v296_v51, %v296_v51  ;;  %1613 = vmatprep.mubr.msk.f32.mxu0 %vm353_vm4, %v341_v49  ;;  %v324_v59 = vrot.slane %v296_v51, %v1973_v31  ;;  %v810_v38 = vrot.slane %v772_v29, %v1973_v31 }
 0x130   :  { %v344_v60 = vmul.f32 %v1968_v25, %v316_v54  ;;  %v347_v61 = vmul.f32 %v1979_v41, %v328_v56  ;;  %1614 = vmatmul.mubr.msk.f32.vlgmr.msra.gmra.mrb[4].mxu0 %vm353_vm4, %v342_v55  ;;  %v788_v39 = vcombine.high %v772_v29, %v772_v29  ;;  %v806_v40 = vrot.slane %v789_v30, %v1973_v31 }
 0x131   :  { %v332_v62 = vrot.slane %v300_v58, %v1973_v31  ;;  %v346_v63 = vmul.f32 %v324_v59, %v1991_v52  ;;  %1616 = vmatprep.mubr.msk.f32.mxu0 %vm353_vm4, %v343_v53  ;;  %v814_v47 = vrot.slane %v786_v37, %v1973_v31  ;;  %v790_v49 = vcombine.high %v786_v37, %v786_v37 }
 0x132   :  { %v818_v51 = vrot.slane %v788_v39, %v1973_v31 }
 0x133   :  { %v348_v1 = vmul.f32 %v1986_v48, %v332_v62  ;;  %v822_v58 = vrot.slane %v790_v49, %v1973_v31 }
 0x134   :  { %1617 = vmatmul.mubr.msk.f32.gmra.mrb[6].mxu0 %vm353_vm4, %v344_v60 }
 0x135   :  { %1619 = vmatprep.mubr.msk.f32.mxu0 %vm353_vm4, %v345_v57 }
 0x138   :  { %1620 = vmatmul.mubr.msk.f32.gmra.mrb[8].mxu0 %vm353_vm4, %v346_v63 }
 0x139   :  { %1622 = vmatprep.mubr.msk.f32.mxu0 %vm353_vm4, %v347_v61 }
 0x13c   :  { %1623 = vmatmul.mubr.msk.f32.gmra.mrb[10].mxu0 %vm353_vm4, %v348_v1 }
 0x13d   :  { %1643 = vmatprep.mubr.msk.bf16.mxu0 %vm1832_vm0, %v1831_v0 }
 0x203   :  { %v1615_v2 = vpop.f32.mrb[4].mxu0 }
 0x204   :  { %515 = vxpose.xlu0.b32.start.end [1/1] (short) (narrow) %v1615_v2, 8  ;;  %v444_v3 = vpop.f32.mrb[5].mxu0 }
 0x207   :  { %v1618_v4 = vpop.f32.mrb[6].mxu0 }
 0x208   :  { %483 = vxpose.xlu0.b32.start.end [1/1] (short) (narrow) %v444_v3, 8  ;;  %579 = vxpose.xlu1.b32.start.end [1/1] (short) (narrow) %v1618_v4, 8  ;;  %v454_v5 = vpop.f32.mrb[7].mxu0 }
 0x20b   :  { %v1621_v6 = vpop.f32.mrb[8].mxu0 }
 0x20c   :  { %547 = vxpose.xlu1.b32.start.end [1/1] (short) (narrow) %v454_v5, 8  ;;  %v464_v7 = vpop.f32.mrb[9].mxu0 }
 0x20d   :  { %611 = vxpose.xlu0.b32.start.end [1/1] (short) (narrow) %v464_v7, 8 }
 0x20f   :  { %v1624_v8 = vpop.f32.mrb[10].mxu0 }
 0x210   :  { %643 = vxpose.xlu1.b32.start.end [1/1] (short) (narrow) %v1621_v6, 8  ;;  %v474_v9 = vpop.f32.mrb[11].mxu0 }
 0x211   :  { %675 = vxpose.xlu0.b32.start.end [1/1] (short) (narrow) %v474_v9, 8 }
 0x214   :  { %707 = vxpose.xlu1.b32.start.end [1/1] (short) (narrow) %v1624_v8, 8 }
 0x284   :  { %v531_v19 = vpop.trf.xlu0 }
 0x285   :  { %v832_v20 = vadd.f32 %v798_v16, %v531_v19 }
 0x287   :  { %v842_v32 = vsel %vm170_vm2, %v832_v20, -inf }
 0x288   :  { %v499_v33 = vpop.trf.xlu0  ;;  %v595_v34 = vpop.trf.xlu1  ;;  %843 = vmax.xlane.f32.xlu1 %v842_v32 }
 0x289   :  { %v831_v35 = vadd.f32 %v794_v21, %v499_v33  ;;  %v834_v53 = vadd.f32 %v806_v40, %v595_v34 }
 0x28b   :  { %v839_v42 = vsel %vm170_vm2, %v831_v35, -inf  ;;  %v848_v60 = vsel %vm170_vm2, %v834_v53, -inf }
 0x28c   :  { %v563_v44 = vpop.trf.xlu1  ;;  %840 = vmax.xlane.f32.xlu0 %v839_v42 }
 0x28d   :  { %v833_v45 = vadd.f32 %v802_v36, %v563_v44  ;;  %v627_v46 = vpop.trf.xlu0 }
 0x28e   :  { %v835_v50 = vadd.f32 %v810_v38, %v627_v46 }
 0x28f   :  { %v845_v22 = vsel %vm170_vm2, %v833_v45, -inf }
 0x290   :  { %846 = vmax.xlane.f32.xlu1 %v845_v22  ;;  %v851_v54 = vsel %vm170_vm2, %v835_v50, -inf  ;;  %v659_v55 = vpop.trf.xlu1 }
 0x291   :  { %852 = vmax.xlane.f32.xlu0 %v851_v54  ;;  %v691_v56 = vpop.trf.xlu0  ;;  %v836_v57 = vadd.f32 %v814_v47, %v659_v55 }
 0x292   :  { %v837_v59 = vadd.f32 %v818_v51, %v691_v56  ;;  %v1183_v51 = vld [vmem:[%s2098_s7] sm:$0xff]  ;;  %s1834_s7 = smov 96  }
 0x293   :  { %v854_v63 = vsel %vm170_vm2, %v836_v57, -inf  ;;  %1625 = vmatprep.subr.mxu1 %v1183_v51 }
 0x294   :  { %849 = vmax.xlane.f32.xlu1 %v848_v60  ;;  %v857_v61 = vsel %vm170_vm2, %v837_v59, -inf  ;;  %v723_v62 = vpop.trf.xlu1  ;;  %1626 = vmatpush3.msra.mxu1 %v1183_v51 }
 0x295   :  { %858 = vmax.xlane.f32.xlu0 %v857_v61  ;;  %v838_v1 = vadd.f32 %v822_v58, %v723_v62 }
 0x297   :  { %v860_v2 = vsel %vm170_vm2, %v838_v1, -inf }
 0x298   :  { %855 = vmax.xlane.f32.xlu1 %v854_v63 }
 0x29c   :  { %861 = vmax.xlane.f32.xlu1 %v860_v2 }
 0x315   :  { %v844_v3 = vpop.xlane.xlu1 %843 }
 0x316   :  { %v864_v4 = vsub.f32 %v832_v20, %v844_v3 }
 0x318   :  { %v873_v5 = vmul.f32 1.442695, %v864_v4 }
 0x319   :  { %v841_v6 = vpop.xlane.xlu0 %840 }
 0x31a   :  { %1675 = vpow2.f32 %v873_v5  ;;  %v863_v31 = vsub.f32 %v831_v35, %v841_v6 }
 0x31c   :  { %v871_v7 = vmul.f32 1.442695, %v863_v31 }
 0x31d   :  { %v847_v8 = vpop.xlane.xlu1 %846 }
 0x31e   :  { %1677 = vpow2.f32 %v871_v7  ;;  %v865_v9 = vsub.f32 %v833_v45, %v847_v8  ;;  %v853_v10 = vpop.xlane.xlu0 %852 }
 0x31f   :  { %v867_v11 = vsub.f32 %v835_v50, %v853_v10 }
 0x320   :  { %v875_v12 = vmul.f32 1.442695, %v865_v9 }
 0x321   :  { %v879_v13 = vmul.f32 1.442695, %v867_v11  ;;  %v850_v14 = vpop.xlane.xlu1 %849 }
 0x322   :  { %1679 = vpow2.f32 %v875_v12  ;;  %v866_v15 = vsub.f32 %v834_v53, %v850_v14  ;;  %v859_v16 = vpop.xlane.xlu0 %858 }
 0x323   :  { %v869_v17 = vsub.f32 %v837_v59, %v859_v16  ;;  %1681 = vpow2.f32 %v879_v13 }
 0x324   :  { %v1676_v18 = vpop.eup %1675  ;;  %v877_v19 = vmul.f32 1.442695, %v866_v15 }
 0x325   :  { %v883_v20 = vmul.f32 1.442695, %v869_v17  ;;  %v856_v21 = vpop.xlane.xlu1 %855  ;;  %v890_v26 = vsel %vm170_vm2, %v1676_v18, 0.0 }
 0x326   :  { %1683 = vpow2.f32 %v877_v19  ;;  %v868_v28 = vsub.f32 %v836_v57, %v856_v21  ;;  %891 = vadd.xlane.f32.xlu1 %v890_v26 }
 0x327   :  { %1685 = vpow2.f32 %v883_v20 }
 0x328   :  { %v1678_v29 = vpop.eup %1677  ;;  %v881_v30 = vmul.f32 1.442695, %v868_v28 }
 0x329   :  { %v862_v32 = vpop.xlane.xlu1 %861  ;;  %v887_v33 = vsel %vm170_vm2, %v1678_v29, 0.0 }
 0x32a   :  { %1687 = vpow2.f32 %v881_v30  ;;  %v870_v34 = vsub.f32 %v838_v1, %v862_v32  ;;  %888 = vadd.xlane.f32.xlu0 %v887_v33 }
 0x32c   :  { %v1680_v35 = vpop.eup %1679  ;;  %v885_v36 = vmul.f32 1.442695, %v870_v34 }
 0x32d   :  { %v893_v37 = vsel %vm170_vm2, %v1680_v35, 0.0  ;;  %v1682_v38 = vpop.eup %1681 }
 0x32e   :  { %1689 = vpow2.f32 %v885_v36  ;;  %894 = vadd.xlane.f32.xlu0 %v893_v37  ;;  %v899_v42 = vsel %vm170_vm2, %v1682_v38, 0.0 }
 0x330   :  { %v1684_v39 = vpop.eup %1683 }
 0x331   :  { %v896_v40 = vsel %vm170_vm2, %v1684_v39, 0.0  ;;  %v1686_v44 = vpop.eup %1685 }
 0x332   :  { %897 = vadd.xlane.f32.xlu1 %v896_v40  ;;  %900 = vadd.xlane.f32.xlu0 %v899_v42  ;;  %v905_v47 = vsel %vm170_vm2, %v1686_v44, 0.0 }
 0x334   :  { %v1688_v45 = vpop.eup %1687 }
 0x335   :  { %v902_v46 = vsel %vm170_vm2, %v1688_v45, 0.0 }
 0x336   :  { %903 = vadd.xlane.f32.xlu1 %v902_v46  ;;  %906 = vadd.xlane.f32.xlu0 %v905_v47 }
 0x338   :  { %v1690_v49 = vpop.eup %1689 }
 0x339   :  { %v908_v50 = vsel %vm170_vm2, %v1690_v49, 0.0 }
 0x33a   :  { %909 = vadd.xlane.f32.xlu1 %v908_v50 }
 0x3b3   :  { %v892_v53 = vpop.xlane.xlu1 %891 }
 0x3b4   :  { %1691 = vrcp.f32 %v892_v53 }
 0x3b7   :  { %v889_v22 = vpop.xlane.xlu0 %888 }
 0x3b8   :  { %1693 = vrcp.f32 %v889_v22 }
 0x3bb   :  { %v895_v54 = vpop.xlane.xlu0 %894 }
 0x3be   :  { %v1692_v55 = vpop.eup %1691 }
 0x3bf   :  { %v898_v56 = vpop.xlane.xlu1 %897  ;;  %v914_v57 = vmul.f32 %v1692_v55, %v1676_v18  ;;  %v901_v58 = vpop.xlane.xlu0 %900 }
 0x3c0   :  { %1695 = vrcp.f32 %v898_v56 }
 0x3c1   :  { %959 = vxpose.xlu1.b32.start.end [1/1] (short) (narrow) %v914_v57, 8  ;;  %1697 = vrcp.f32 %v895_v54 }
 0x3c2   :  { %v1694_v59 = vpop.eup %1693 }
 0x3c3   :  { %v904_v60 = vpop.xlane.xlu1 %903  ;;  %v912_v61 = vmul.f32 %v1694_v59, %v1678_v29  ;;  %v907_v62 = vpop.xlane.xlu0 %906 }
 0x3c4   :  { %1699 = vrcp.f32 %v904_v60 }
 0x3c5   :  { %927 = vxpose.xlu0.b32.start.end [1/1] (short) (narrow) %v912_v61, 8  ;;  %1701 = vrcp.f32 %v901_v58 }
 0x3c7   :  { %v910_v63 = vpop.xlane.xlu1 %909 }
 0x3c8   :  { %1703 = vrcp.f32 %v910_v63 }
 0x3c9   :  { %1705 = vrcp.f32 %v907_v62 }
 0x3ca   :  { %v1696_v1 = vpop.eup %1695 }
 0x3cb   :  { %v918_v2 = vmul.f32 %v1696_v1, %v1684_v39  ;;  %v1698_v3 = vpop.eup %1697 }
 0x3cc   :  { %v916_v6 = vmul.f32 %v1698_v3, %v1680_v35 }
 0x3cd   :  { %1023 = vxpose.xlu0.b32.start.end [1/1] (short) (narrow) %v918_v2, 8 }
 0x3ce   :  { %v1700_v4 = vpop.eup %1699 }
 0x3cf   :  { %v922_v5 = vmul.f32 %v1700_v4, %v1688_v45  ;;  %v1702_v31 = vpop.eup %1701 }
 0x3d0   :  { %v920_v9 = vmul.f32 %v1702_v31, %v1682_v38 }
 0x3d1   :  { %1087 = vxpose.xlu1.b32.start.end [1/1] (short) (narrow) %v922_v5, 8  ;;  %991 = vxpose.xlu0.b32.start.end [1/1] (short) (narrow) %v916_v6, 8 }
 0x3d2   :  { %v1704_v7 = vpop.eup %1703 }
 0x3d3   :  { %v926_v8 = vmul.f32 %v1704_v7, %v1690_v49  ;;  %v1706_v10 = vpop.eup %1705 }
 0x3d4   :  { %v924_v11 = vmul.f32 %v1706_v10, %v1686_v44 }
 0x3d5   :  { %1151 = vxpose.xlu1.b32.start.end [1/1] (short) (narrow) %v926_v8, 8  ;;  %1055 = vxpose.xlu0.b32.start.end [1/1] (short) (narrow) %v920_v9, 8 }
 0x3d9   :  { %1119 = vxpose.xlu0.b32.start.end [1/1] (short) (narrow) %v924_v11, 8 }
 0x3f3   :  { %1323 = vrot.lane.b32.xlu1 %v1970_v27, %s1834_s7 }
 0x3f7   :  { %1325 = vrot.lane.b32.xlu1 %v1964_v23, %s1834_s7 }
 0x3fb   :  { %1327 = vrot.lane.b32.xlu1 %v1968_v25, %s1834_s7 }
 0x3ff   :  { %1329 = vrot.lane.b32.xlu1 %v1982_v43, %s1834_s7 }
 0x402   :  { %1321 = vrot.lane.b32.xlu0 %v1966_v24, %s1834_s7 }
 0x403   :  { %1333 = vrot.lane.b32.xlu1 %v1979_v41, %s1834_s7 }
 0x406   :  { %1331 = vrot.lane.b32.xlu0 %v1991_v52, %s1834_s7  ;;  %v1674_v52 = vld [vmem:[%s2096_s5 + $0x8] sm:$0xff]  }
 0x40a   :  { %1335 = vrot.lane.b32.xlu0 %v1986_v48, %s1834_s7  ;;  %v1673_v48 = vld [vmem:[%s2096_s5] sm:$0xff]   ;;  %s1835_s5 = smov [#allocation10]  }
 0x40b   :  { %1640 = vmatpush3.bf16.msra.mxu0 %v1673_v48  ;;  %s1514_s25 = sshll.u32 %s1835_s5, 4  ;;  %s1515_s25 = int_to_ptr.vmem [resolvable:$true] %s1514_s25 }
 0x40c   :  { %1641 = vmatprep.subr.bf16.mxu0 %v1831_v0  ;;  %s1795_s26 = scalar_lea.vmem %s1515_s25, 128  ;;  %p1800_p5 = scmp.lt.s32.totalorder %s1515_s25, %s1515_s25 }
 0x40d   :  { %p1796_p4 = scmp.ne.s32.totalorder %s1515_s25, %s1795_s26  ;;  %p1801_p6 = scmp.lt.s32.totalorder %s1795_s26, %s1795_s26 }
 0x40f   :  { %1642 = vmatpush3.bf16.msra.mxu0 %v1674_v52  ;;  %p1802_p7 = por %p1801_p6, %p1800_p5 }
 0x411   :  { %p1803_p8 = pnand %p1802_p7, %p1796_p4 }
 0x441   :  { %v975_v12 = vpop.trf.xlu1 }
 0x445   :  { %v943_v13 = vpop.trf.xlu0 }
 0x446   :  { %1627 = vmatprep.mubr.msk.f32.mxu1 %vm170_vm2, %v943_v13 }
 0x447   :  { %1628 = vmatmul.mubr.msk.f32.vlgmr.msra.gmra.mrb[8].mxu1 %vm170_vm2, %v975_v12 }
 0x44d   :  { %v1039_v27 = vpop.trf.xlu0 }
 0x451   :  { %v1007_v23 = vpop.trf.xlu0  ;;  %v1103_v25 = vpop.trf.xlu1 }
 0x452   :  { %1630 = vmatprep.mubr.msk.f32.mxu1 %vm170_vm2, %v1007_v23 }
 0x453   :  { %1631 = vmatmul.mubr.msk.f32.gmra.mrb[10].mxu1 %vm170_vm2, %v1039_v27 }
 0x455   :  { %v1071_v24 = vpop.trf.xlu0  ;;  %v1167_v41 = vpop.trf.xlu1 }
 0x456   :  { %1633 = vmatprep.mubr.msk.f32.mxu1 %vm170_vm2, %v1071_v24 }
 0x457   :  { %1634 = vmatmul.mubr.msk.f32.gmra.mrb[12].mxu1 %vm170_vm2, %v1103_v25 }
 0x459   :  { %v1135_v43 = vpop.trf.xlu0 }
 0x45a   :  { %1636 = vmatprep.mubr.msk.f32.mxu1 %vm170_vm2, %v1135_v43 }
 0x45b   :  { %1637 = vmatmul.mubr.msk.f32.gmra.mrb[14].mxu1 %vm170_vm2, %v1167_v41 }
 0x465   :  { %v1324_v14 = vpop.permute.xlu1 %1323 }
 0x469   :  { %v1326_v20 = vpop.permute.xlu1 %1325 }
 0x46d   :  { %v1328_v33 = vpop.permute.xlu1 %1327 }
 0x471   :  { %v1330_v47 = vpop.permute.xlu1 %1329 }
 0x474   :  { %v1322_v16 = vpop.permute.xlu0 %1321 }
 0x475   :  { %v1334_v31 = vpop.permute.xlu1 %1333 }
 0x478   :  { %v1332_v44 = vpop.permute.xlu0 %1331 }
 0x47c   :  { %v1336_v2 = vpop.permute.xlu0 %1335 }
 0x51a   :  { %v1629_v15 = vpop.f32.mrb[8].mxu1 }
 0x51b   :  { %v1346_v17 = vmul.f32 %v1629_v15, %v1324_v14  ;;  %v1274_v18 = vpop.f32.mrb[9].mxu1 }
 0x51c   :  { %v1345_v19 = vmul.f32 %v1322_v16, %v1274_v18 }
 0x51d   :  { %v1360_v21 = vsel %vm353_vm4, %v1346_v17, 0.0 }
 0x51e   :  { %v1361_v26 = vrot.slane %v1360_v21, 4  ;;  %v1353_v28 = vsel %vm353_vm4, %v1345_v19, 0.0 }
 0x51f   :  { %v1354_v29 = vrot.slane %v1353_v28, 4 }
 0x520   :  { %v1362_v30 = vadd.f32 %v1361_v26, %v1360_v21 }
 0x521   :  { %v1355_v0 = vadd.f32 %v1354_v29, %v1353_v28 }
 0x522   :  { %v1363_v32 = vrot.slane %v1362_v30, 2 }
 0x523   :  { %v1356_v34 = vrot.slane %v1355_v0, 2 }
 0x524   :  { %v1364_v35 = vadd.f32 %v1363_v32, %v1362_v30 }
 0x525   :  { %v1357_v36 = vadd.f32 %v1356_v34, %v1355_v0 }
 0x526   :  { %v1365_v37 = vrot.slane %v1364_v35, 1  ;;  %v1632_v38 = vpop.f32.mrb[10].mxu1 }
 0x527   :  { %v1358_v39 = vrot.slane %v1357_v36, 1  ;;  %v1348_v40 = vmul.f32 %v1632_v38, %v1328_v33  ;;  %v1284_v42 = vpop.f32.mrb[11].mxu1 }
 0x528   :  { %v1366_v45 = vadd.f32 %v1365_v37, %v1364_v35  ;;  %v1347_v46 = vmul.f32 %v1326_v20, %v1284_v42 }
 0x529   :  { %v1359_v49 = vadd.f32 %v1358_v39, %v1357_v36  ;;  %v1374_v50 = vsel %vm353_vm4, %v1348_v40, 0.0 }
 0x52a   :  { %v1410_v51 = vpack.c.bf16 %v1366_v45, %v1366_v45  ;;  %v1375_v53 = vrot.slane %v1374_v50, 4  ;;  %v1367_v22 = vsel %vm353_vm4, %v1347_v46, 0.0  ;;  %v1635_v54 = vpop.f32.mrb[12].mxu1 }
 0x52b   :  { %v1409_v55 = vpack.c.bf16 %v1359_v49, %v1359_v49  ;;  %v1368_v56 = vrot.slane %v1367_v22, 4  ;;  %v1350_v57 = vmul.f32 %v1635_v54, %v1332_v44  ;;  %v1294_v58 = vpop.f32.mrb[13].mxu1 }
 0x52c   :  { %v1430_v59 = vunpack.c.l.b16 %v1410_v51  ;;  %v1376_v60 = vadd.f32 %v1375_v53, %v1374_v50  ;;  %v1349_v61 = vmul.f32 %v1330_v47, %v1294_v58 }
 0x52d   :  { %v1429_v62 = vunpack.c.l.b16 %v1409_v55  ;;  %v1369_v63 = vadd.f32 %v1368_v56, %v1367_v22  ;;  %v1388_v1 = vsel %vm353_vm4, %v1350_v57, 0.0 }
 0x52e   :  { %v1377_v3 = vrot.slane %v1376_v60, 2  ;;  %v1389_v4 = vrot.slane %v1388_v1, 4  ;;  %v1381_v5 = vsel %vm353_vm4, %v1349_v61, 0.0  ;;  %v1638_v6 = vpop.f32.mrb[14].mxu1 }
 0x52f   :  { %v1438_v7 = vsel %vm1437_vm5, %v1430_v59, %v1429_v62  ;;  %v1370_v8 = vrot.slane %v1369_v63, 2  ;;  %v1382_v9 = vrot.slane %v1381_v5, 4  ;;  %v1352_v10 = vmul.f32 %v1638_v6, %v1336_v2  ;;  %v1304_v11 = vpop.f32.mrb[15].mxu1 }
 0x530   :  { %v1378_v12 = vadd.f32 %v1377_v3, %v1376_v60  ;;  %v1390_v13 = vadd.f32 %v1389_v4, %v1388_v1  ;;  %v1351_v27 = vmul.f32 %v1334_v31, %v1304_v11 }
 0x531   :  { %v1371_v23 = vadd.f32 %v1370_v8, %v1369_v63  ;;  %v1383_v25 = vadd.f32 %v1382_v9, %v1381_v5  ;;  %v1402_v24 = vsel %vm353_vm4, %v1352_v10, 0.0 }
 0x532   :  { %v1379_v41 = vrot.slane %v1378_v12, 1  ;;  %v1391_v43 = vrot.slane %v1390_v13, 2  ;;  %v1403_v48 = vrot.slane %v1402_v24, 4  ;;  %v1395_v52 = vsel %vm353_vm4, %v1351_v27, 0.0 }
 0x533   :  { %v1372_v14 = vrot.slane %v1371_v23, 1  ;;  %v1384_v15 = vrot.slane %v1383_v25, 2  ;;  %v1396_v16 = vrot.slane %v1395_v52, 4 }
 0x534   :  { %v1380_v17 = vadd.f32 %v1379_v41, %v1378_v12  ;;  %v1392_v18 = vadd.f32 %v1391_v43, %v1390_v13  ;;  %v1404_v19 = vadd.f32 %v1403_v48, %v1402_v24 }
 0x535   :  { %v1373_v20 = vadd.f32 %v1372_v14, %v1371_v23  ;;  %v1385_v21 = vadd.f32 %v1384_v15, %v1383_v25  ;;  %v1397_v26 = vadd.f32 %v1396_v16, %v1395_v52 }
 0x536   :  { %v1412_v28 = vpack.c.bf16 %v1380_v17, %v1380_v17  ;;  %v1393_v29 = vrot.slane %v1392_v18, 1  ;;  %v1405_v30 = vrot.slane %v1404_v19, 2 }
 0x537   :  { %v1411_v0 = vpack.c.bf16 %v1373_v20, %v1373_v20  ;;  %v1386_v32 = vrot.slane %v1385_v21, 1  ;;  %v1398_v33 = vrot.slane %v1397_v26, 2 }
 0x538   :  { %v1394_v34 = vadd.f32 %v1393_v29, %v1392_v18  ;;  %v1406_v35 = vadd.f32 %v1405_v30, %v1404_v19  ;;  %v1432_v39 = vunpack.c.l.b16 %v1412_v28 }
 0x539   :  { %v1431_v36 = vunpack.c.l.b16 %v1411_v0  ;;  %v1387_v37 = vadd.f32 %v1386_v32, %v1385_v21  ;;  %v1399_v38 = vadd.f32 %v1398_v33, %v1397_v26 }
 0x53a   :  { %v1414_v40 = vpack.c.bf16 %v1394_v34, %v1394_v34  ;;  %v1407_v42 = vrot.slane %v1406_v35, 1 }
 0x53b   :  { %v1440_v44 = vsel %vm1439_vm6, %v1431_v36, %v1438_v7  ;;  %v1413_v45 = vpack.c.bf16 %v1387_v37, %v1387_v37  ;;  %v1400_v46 = vrot.slane %v1399_v38, 1 }
 0x53c   :  { %v1442_v47 = vsel %vm1441_vm7, %v1432_v39, %v1440_v44  ;;  %v1408_v49 = vadd.f32 %v1407_v42, %v1406_v35  ;;  %v1434_v53 = vunpack.c.l.b16 %v1414_v40 }
 0x53d   :  { %v1433_v50 = vunpack.c.l.b16 %v1413_v45  ;;  %v1401_v51 = vadd.f32 %v1400_v46, %v1399_v38 }
 0x53e   :  { %v1416_v22 = vpack.c.bf16 %v1408_v49, %v1408_v49 }
 0x53f   :  { %v1444_v54 = vsel %vm1443_vm8, %v1433_v50, %v1442_v47  ;;  %v1415_v55 = vpack.c.bf16 %v1401_v51, %v1401_v51 }
 0x540   :  { %v1446_v56 = vsel %vm1445_vm9, %v1434_v53, %v1444_v54  ;;  %v1436_v58 = vunpack.c.l.b16 %v1416_v22 }
 0x541   :  { %v1435_v57 = vunpack.c.l.b16 %v1415_v55 }
 0x543   :  { %v1448_v59 = vsel %vm1447_vm10, %v1435_v57, %v1446_v56 }
 0x544   :  { %v1450_v60 = vsel %vm1449_vm11, %v1436_v58, %v1448_v59 }
 0x545   :  { %v1451_v61 = vpack.c.b16 %v1450_v60, %v1450_v60 }
 0x547   :  { %1644 = vmatmul.mubr.msk.bf16.vlgmr.msra.gmra.mrb[12].mxu0 %vm353_vm4, %v1451_v61 }
 0x61a   :  { %v1501_v62 = vpop.f32.mrb[12].mxu0 }
 0x61b   :  { %1507 = vst [vmem:[#allocation10] sm:$0xff] %v1501_v62  ;;  %v1645_v63 = vpop.f32.mrb[13].mxu0 }
 0x61c   :  { %v1504_v1 = vpop.f32.mrb[14].mxu0 }
 0x61d   :  { %1806 = shalt.err (!%p1803_p8)
}
 0x61e   :  { %s1807_s3 = scalar_lea.hbm %s2099_s8, 128 }
 0x61f   :  { %p1808_p9 = scmp.ne.s32.totalorder %s2099_s8, %s1807_s3  ;;  %p1811_p10 = scmp.lt.u32.totalorder %s1807_s3, %s2099_s8 }
 0x621   :  { %p1813_p11 = pnand %p1811_p10, %p1808_p9 }
 0x623   :  { %1816 = shalt.err (!%p1813_p11)
}
 0x624   :  { %1517 = dma.vmem_to_hbm [thread:$0]  %s1515_s25, 128, %s2099_s8, [#allocation4]   ;;  %v1646_v2 = vpop.f32.mrb[15].mxu0 }
 0x625   :  { %1823 = dma.done.wait [#allocation4], 128  }
 0x626   :  { %1824 = vsyncadd [#allocation4], 4294967168 }
 0x627   :  { %1521 = vsyncpa [#allocation3], 1 }
 0x628   :  { %1522 = vsyncpa [#allocation6], 1 }
 0x629   :  { %1523 = vsyncpa [#allocation9], 1 }
 0x62a   :  { %1524 = vsyncpa [#allocation4], 1 }

</bundles_post_ra>
